<compile_context>
chip_gen: v5e
topology: v5e:2x2
jax: 0.10.0
libtpu: 0.0.40
codegen_flags: <defaults>
</compile_context>

<pallas_src>
import functools

import jax
import jax.numpy as jnp
from jax.experimental import pallas as pl
from jax.experimental.pallas import tpu as pltpu

MARGIN = 2.0
EPS = 1e-6  # F.pairwise_distance default eps

_MIB = 1024 * 1024


def _contrastive_loss_kernel(o1_ref, o2_ref, label_ref, out_ref, acc_ref, *,
                             true_b, margin, tiles_per_core, row_tile,
                             needs_mask):
    step = pl.program_id(1)

    @pl.when(step == 0)
    def _init():
        acc_ref[...] = jnp.zeros_like(acc_ref)

    o1 = o1_ref[...].astype(jnp.float32)        # (TB, D)  VPU elementwise
    o2 = o2_ref[...].astype(jnp.float32)        # (TB, D)
    lab = label_ref[...].astype(jnp.float32)    # (TB, 1)

    diff = o1 - o2 + EPS                        # matches F.pairwise_distance
    dist_sq = jnp.sum(diff * diff, axis=-1, keepdims=True)   # (TB, 1) XLU
    dist = jnp.sqrt(dist_sq)                                  # EUP

    pos = (1.0 - lab) * dist_sq
    neg = lab * jnp.square(jnp.maximum(margin - dist, 0.0))
    per_row = pos + neg                                       # (TB, 1)

    if needs_mask:
        core = pl.program_id(0)
        global_tile = core * tiles_per_core + step
        row = (jax.lax.broadcasted_iota(jnp.int32, (row_tile, 1), 0)
               + global_tile * row_tile)
        per_row = jnp.where(row < true_b, per_row, 0.0)

    # Per-core partial sum into the private scratch accumulator.
    acc_ref[...] += jnp.sum(per_row, axis=0, keepdims=True)

    @pl.when(step == pl.num_programs(1) - 1)
    def _finalize():
        # Lane-dense (8, 128) output slab; one write per core, at the end.
        out_ref[...] = jnp.broadcast_to(
            acc_ref[...] * (1.0 / true_b), out_ref.shape)


def _tpu_memory_and_cores():
    """Returns (input double-buffer budget bytes, vmem_limit_bytes, cores)."""
    kind = ""
    try:
        kind = jax.devices()[0].device_kind.lower()
    except Exception:
        kind = ""
    vmem_cap = None
    try:
        vmem_cap = int(pltpu.get_tpu_info().vmem_capacity_bytes)
    except Exception:
        vmem_cap = None

    if ("v7" in kind) or ("7x" in kind):
        # 64 MiB physical VMEM per TC, 2 TensorCores per chip, ~3.2 TB/s HBM.
        budget, limit, cores = 24 * _MIB, 32 * _MIB, 2
    elif ("v6" in kind) or ("v5p" in kind) or ("v4" in kind):
        budget, limit, cores = 24 * _MIB, 32 * _MIB, 1
    else:
        # v5e / unknown: conservative (default scoped VMEM is 16 MiB).
        budget, limit, cores = 12 * _MIB, 24 * _MIB, 1

    if vmem_cap is not None:
        # Never ask for more than half the physical VMEM (guards v7x 64 MiB).
        limit = min(limit, vmem_cap // 2)
        budget = min(budget, (limit * 3) // 4)
    return budget, limit, cores


def _choose_row_tile(B, D, feat_itemsize, label_itemsize, budget, granule):
    # Lane-padded, double-buffered footprint of the pipelined inputs:
    #   2 feature inputs * 2 buffers * TB * ceil(D/128)*128 * itemsize
    # + 1 label  input   * 2 buffers * TB * 128            * itemsize
    d_pad = ((D + 127) // 128) * 128
    per_row_bytes = 4 * d_pad * feat_itemsize + 2 * 128 * label_itemsize
    tb = budget // per_row_bytes
    tb = max(granule, (int(tb) // granule) * granule)   # sublane granule align
    b_pad = ((B + granule - 1) // granule) * granule
    tb = min(tb, b_pad)
    if tb >= B:
        tb = B                      # single full-extent block (always legal)
    return tb


def contrastive_loss(output1, output2, label, *, margin=MARGIN,
                     row_tile=None, force_num_cores=None):
    output1 = jnp.asarray(output1)
    output2 = jnp.asarray(output2)
    label = jnp.asarray(label)

    B, D = output1.shape
    assert output2.shape == (B, D)
    if label.ndim == 1:
        label = label[:, None]
    assert label.shape == (B, 1)

    feat_itemsize = jnp.dtype(output1.dtype).itemsize
    label_itemsize = jnp.dtype(label.dtype).itemsize
    granule = max(8, 32 // feat_itemsize, 32 // label_itemsize)

    budget, vmem_limit, hw_cores = _tpu_memory_and_cores()
    num_cores = hw_cores if force_num_cores is None else int(force_num_cores)

    if row_tile is None:
        tb = _choose_row_tile(B, D, feat_itemsize, label_itemsize,
                              budget, granule)
    else:
        tb = min(B, max(granule, (int(row_tile) // granule) * granule))

    tiles_total = pl.cdiv(B, tb)
    grid_c = max(1, min(num_cores, tiles_total))
    tiles_per_core = pl.cdiv(tiles_total, grid_c)
    needs_mask = (grid_c * tiles_per_core * tb) != B

    def tile_index_map(c, i):
        # Clamp any redundant tail tile (odd tile count split over 2 cores)
        # back in-bounds; its contribution is masked out in the kernel.
        return (jnp.minimum(c * tiles_per_core + i, tiles_total - 1), 0)

    kernel = functools.partial(
        _contrastive_loss_kernel,
        true_b=B,
        margin=float(margin),
        tiles_per_core=tiles_per_core,
        row_tile=tb,
        needs_mask=needs_mask,
    )

    out = pl.pallas_call(
        kernel,
        out_shape=jax.ShapeDtypeStruct((grid_c * 8, 128), jnp.float32),
        grid=(grid_c, tiles_per_core),
        in_specs=[
            pl.BlockSpec((tb, D), tile_index_map),
            pl.BlockSpec((tb, D), tile_index_map),
            pl.BlockSpec((tb, 1), tile_index_map),
        ],
        out_specs=pl.BlockSpec((8, 128), lambda c, i: (c, 0)),
        scratch_shapes=[pltpu.VMEM((1, 1), jnp.float32)],
        compiler_params=pltpu.CompilerParams(
            dimension_semantics=("parallel", "arbitrary"),
            vmem_limit_bytes=vmem_limit,
        ),
    )(output1, output2, label)

    # Each (8, 128) slab holds one core's partial mean; sum the C partials.
    return jnp.sum(out[::8, 0])


def contrastive_loss_ref(output1, output2, label, margin=MARGIN):
    # Pure-JAX reference mirroring the torch module.
    diff = output1.astype(jnp.float32) - output2.astype(jnp.float32) + EPS
    dist = jnp.sqrt(jnp.sum(diff * diff, axis=-1, keepdims=True))
    return jnp.mean(
        (1.0 - label) * dist ** 2
        + label * jnp.clip(margin - dist, 0.0, None) ** 2
    )


if __name__ == "__main__":
    key = jax.random.PRNGKey(0)
    k1, k2, k3 = jax.random.split(key, 3)

    # Small shape consistent with the module (siamese embeddings).
    B, D = 8, 32
    output1 = jax.random.normal(k1, (B, D), dtype=jnp.float32)
    output2 = jax.random.normal(k2, (B, D), dtype=jnp.float32)
    label = jax.random.bernoulli(k3, 0.5, (B, 1)).astype(jnp.float32)

    loss = jax.block_until_ready(contrastive_loss(output1, output2, label))
    ref = contrastive_loss_ref(output1, output2, label)
    assert jnp.allclose(loss, ref, rtol=1e-5, atol=1e-5), (loss, ref)

    # Exercise the multi-tile, masked, 2-"core" parallel-axis path with a
    # forced small row tile (correct-but-serial on single-TensorCore chips).
    B2, D2 = 100, 32
    kk1, kk2, kk3 = jax.random.split(jax.random.PRNGKey(0), 3)
    o1b = jax.random.normal(kk1, (B2, D2), dtype=jnp.float32)
    o2b = jax.random.normal(kk2, (B2, D2), dtype=jnp.float32)
    labb = jax.random.bernoulli(kk3, 0.5, (B2, 1)).astype(jnp.float32)
    loss2 = jax.block_until_ready(
        contrastive_loss(o1b, o2b, labb, row_tile=16, force_num_cores=2))
    ref2 = contrastive_loss_ref(o1b, o2b, labb)
    assert jnp.allclose(loss2, ref2, rtol=1e-5, atol=1e-5), (loss2, ref2)

    print("KERNEL_OK")
</pallas_src>

<mosaic_0001>
module attributes {stable_mosaic.version = 11 : i64} {
  func.func @_contrastive_loss_kernel(%arg0: i32, %arg1: i32, %arg2: memref<8x32xf32, #tpu.memory_space<vmem>>, %arg3: memref<8x32xf32, #tpu.memory_space<vmem>>, %arg4: memref<8x1xf32, #tpu.memory_space<vmem>>, %arg5: memref<8x128xf32, #tpu.memory_space<vmem>>, %arg6: memref<1x1xf32, #tpu.memory_space<vmem>>) attributes {dimension_semantics = [#tpu.dimension_semantics<parallel>, #tpu.dimension_semantics<arbitrary>], iteration_bounds = array<i64: 1, 1>, scalar_prefetch = 0 : i64, scratch_operands = 1 : i64, tpu.core_type = #tpu.core_type<tc>, window_params = [{transform_indices = @transform_0, window_bounds = array<i64: 8, 32>}, {transform_indices = @transform_1, window_bounds = array<i64: 8, 32>}, {transform_indices = @transform_2, window_bounds = array<i64: 8, 1>}, {transform_indices = @transform_3, window_bounds = array<i64: 8, 128>}]} {
    %c0_i32 = arith.constant 0 : i32
    %0 = arith.cmpi eq, %arg1, %c0_i32 : i32
    %1 = arith.extui %0 : i1 to i32
    %c0_i32_0 = arith.constant 0 : i32
    %2 = arith.cmpi ne, %1, %c0_i32_0 : i32
    scf.if %2 {
      %cst_17 = arith.constant 0.000000e+00 : f32
      %31 = vector.broadcast %cst_17 : f32 to vector<1x1xf32>
      %c0_18 = arith.constant 0 : index
      %c0_19 = arith.constant 0 : index
      %32 = vector.load %arg6[%c0_18, %c0_19] : memref<1x1xf32, #tpu.memory_space<vmem>>, vector<1x1xf32>
      tpu.vector_store %arg6[%c0_18, %c0_19], %31 {strides = array<i32>} : memref<1x1xf32, #tpu.memory_space<vmem>>, vector<1x1xf32>,
    } else {
    }
    %c0 = arith.constant 0 : index
    %c0_1 = arith.constant 0 : index
    %3 = vector.load %arg2[%c0, %c0_1] : memref<8x32xf32, #tpu.memory_space<vmem>>, vector<8x32xf32>
    %c0_2 = arith.constant 0 : index
    %c0_3 = arith.constant 0 : index
    %4 = vector.load %arg3[%c0_2, %c0_3] : memref<8x32xf32, #tpu.memory_space<vmem>>, vector<8x32xf32>
    %c0_4 = arith.constant 0 : index
    %c0_5 = arith.constant 0 : index
    %5 = vector.load %arg4[%c0_4, %c0_5] : memref<8x1xf32, #tpu.memory_space<vmem>>, vector<8x1xf32>
    %6 = arith.subf %3, %4 : vector<8x32xf32>
    %cst = arith.constant 9.99999997E-7 : f32
    %7 = vector.broadcast %cst : f32 to vector<8x32xf32>
    %8 = arith.addf %6, %7 : vector<8x32xf32>
    %9 = arith.mulf %8, %8 : vector<8x32xf32>
    %cst_6 = arith.constant dense<0.000000e+00> : vector<8xf32>
    %10 = vector.multi_reduction <add>, %9, %cst_6 [1] : vector<8x32xf32> to vector<8xf32>
    %11 = vector.shape_cast %10 : vector<8xf32> to vector<8x1xf32>
    %12 = math.sqrt %11 : vector<8x1xf32>
    %cst_7 = arith.constant 1.000000e+00 : f32
    %13 = vector.broadcast %cst_7 : f32 to vector<8x1xf32>
    %14 = arith.subf %13, %5 : vector<8x1xf32>
    %15 = arith.mulf %14, %11 : vector<8x1xf32>
    %cst_8 = arith.constant 2.000000e+00 : f32
    %16 = vector.broadcast %cst_8 : f32 to vector<8x1xf32>
    %17 = arith.subf %16, %12 : vector<8x1xf32>
    %cst_9 = arith.constant 0.000000e+00 : f32
    %18 = vector.broadcast %cst_9 : f32 to vector<8x1xf32>
    %19 = arith.maximumf %17, %18 : vector<8x1xf32>
    %20 = arith.mulf %19, %19 : vector<8x1xf32>
    %21 = arith.mulf %5, %20 : vector<8x1xf32>
    %22 = arith.addf %15, %21 : vector<8x1xf32>
    %c0_10 = arith.constant 0 : index
    %c0_11 = arith.constant 0 : index
    %23 = vector.load %arg6[%c0_10, %c0_11] : memref<1x1xf32, #tpu.memory_space<vmem>>, vector<1x1xf32>
    %cst_12 = arith.constant dense<0.000000e+00> : vector<1xf32>
    %24 = vector.multi_reduction <add>, %22, %cst_12 [0] : vector<8x1xf32> to vector<1xf32>
    %25 = vector.shape_cast %24 : vector<1xf32> to vector<1x1xf32>
    %26 = arith.addf %23, %25 : vector<1x1xf32>
    %c0_13 = arith.constant 0 : index
    %c0_14 = arith.constant 0 : index
    %27 = vector.load %arg6[%c0_13, %c0_14] : memref<1x1xf32, #tpu.memory_space<vmem>>, vector<1x1xf32>
    tpu.vector_store %arg6[%c0_13, %c0_14], %26 {strides = array<i32>} : memref<1x1xf32, #tpu.memory_space<vmem>>, vector<1x1xf32>,
    %c0_i32_15 = arith.constant 0 : i32
    %28 = arith.cmpi eq, %arg1, %c0_i32_15 : i32
    %29 = arith.extui %28 : i1 to i32
    %c0_i32_16 = arith.constant 0 : i32
    %30 = arith.cmpi ne, %29, %c0_i32_16 : i32
    scf.if %30 {
      %c0_17 = arith.constant 0 : index
      %c0_18 = arith.constant 0 : index
      %31 = vector.load %arg6[%c0_17, %c0_18] : memref<1x1xf32, #tpu.memory_space<vmem>>, vector<1x1xf32>
      %cst_19 = arith.constant 1.250000e-01 : f32
      %32 = vector.broadcast %cst_19 : f32 to vector<1x1xf32>
      %33 = arith.mulf %31, %32 : vector<1x1xf32>
      %34 = vector.shape_cast %33 : vector<1x1xf32> to vector<1x1xf32>
      %35 = vector.broadcast %34 : vector<1x1xf32> to vector<8x128xf32>
      %c0_20 = arith.constant 0 : index
      %c0_21 = arith.constant 0 : index
      %36 = vector.load %arg5[%c0_20, %c0_21] : memref<8x128xf32, #tpu.memory_space<vmem>>, vector<8x128xf32>
      tpu.vector_store %arg5[%c0_20, %c0_21], %35 {strides = array<i32>} : memref<8x128xf32, #tpu.memory_space<vmem>>, vector<8x128xf32>,
    } else {
    }
    return
  }
  func.func @transform_0(%arg0: i32, %arg1: i32) -> (i32, i32) {
    %c1_i32 = arith.constant 1 : i32
    %0 = arith.muli %arg0, %c1_i32 : i32
    %1 = arith.addi %0, %arg1 : i32
    %c0_i32 = arith.constant 0 : i32
    %2 = arith.minsi %1, %c0_i32 : i32
    %c0_i32_0 = arith.constant 0 : i32
    %c0_i32_1 = arith.constant 0 : i32
    return %2, %c0_i32_0 : i32, i32
  }
  func.func @transform_1(%arg0: i32, %arg1: i32) -> (i32, i32) {
    %c1_i32 = arith.constant 1 : i32
    %0 = arith.muli %arg0, %c1_i32 : i32
    %1 = arith.addi %0, %arg1 : i32
    %c0_i32 = arith.constant 0 : i32
    %2 = arith.minsi %1, %c0_i32 : i32
    %c0_i32_0 = arith.constant 0 : i32
    %c0_i32_1 = arith.constant 0 : i32
    return %2, %c0_i32_0 : i32, i32
  }
  func.func @transform_2(%arg0: i32, %arg1: i32) -> (i32, i32) {
    %c1_i32 = arith.constant 1 : i32
    %0 = arith.muli %arg0, %c1_i32 : i32
    %1 = arith.addi %0, %arg1 : i32
    %c0_i32 = arith.constant 0 : i32
    %2 = arith.minsi %1, %c0_i32 : i32
    %c0_i32_0 = arith.constant 0 : i32
    %c0_i32_1 = arith.constant 0 : i32
    return %2, %c0_i32_0 : i32, i32
  }
  func.func @transform_3(%arg0: i32, %arg1: i32) -> (i32, i32) {
    %c0_i32 = arith.constant 0 : i32
    %c0_i32_0 = arith.constant 0 : i32
    return %arg0, %c0_i32 : i32, i32
  }
}

</mosaic_0001>

<bundles_post_ra>
// kernel: tpu_custom_call.1
= control target key start
LH: loop header
LB: loop body
LE: loop exit
PB: predicated region body
PF: predicated region fallthrough
CT: control target
= control target key end

     0   :  { %8 = vsyncpa [#allocation4], 0  ;;  %s278_s0 = inlined_call_operand.vmem [shape: f32[8,32], index: 0, kind: input, shape index: {}]   ;;  %s279_s1 = inlined_call_operand.hbm [shape: f32[8,32], index: 1, kind: input, shape index: {}]   ;;  %s280_s2 = inlined_call_operand.vmem [shape: f32[8,1], index: 2, kind: input, shape index: {}]   ;;  %s281_s3 = inlined_call_operand.hbm [shape: f32[8,128], index: 3, kind: output, shape index: {}]  }
   0x1   :  { %9 = vsyncpa [#allocation5], 0  ;;  %s32_s14 = sshll.u32 %s279_s1, 4  ;;  %s240_s15 = smov [#allocation3]   ;;  %s33_s14 = int_to_ptr.hbm [resolvable:$true] %s32_s14 }
   0x2   :  { %s34_s16 = sshll.u32 %s240_s15, 4  ;;  %s35_s16 = int_to_ptr.vmem [resolvable:$true] %s34_s16 }
   0x3   :  { %37 = dma.hbm_to_vmem [thread:$0]  %s33_s14, 128, %s35_s16, [#allocation4]  }
   0x4   :  { %236 = dma.done.wait [#allocation4], 128  }
   0x5   :  { %237 = vsyncadd [#allocation4], 4294967168  ;;  %vm95_vm0 = vcmask 0   ;;  %v241_v0 = vmov 0.0   ;;  %v97_v1 = vld [vmem:[%s278_s0] sm:$0xff]  ;;  %vm103_vm1 = vcmask 261120  }
   0x6   :  { %96 = vst.msk [vmem:[#allocation2] sm:$0x1] %vm95_vm0, %v241_v0  ;;  %v98_v2 = vld [vmem:[#allocation3] sm:$0xff]  ;;  %v242_v14 = vmov 0   ;;  %vm127_vm4 = vcmask 7168   ;;  %s157_s22 = sshll.u32 %s281_s3, 4  ;;  %s158_s22 = int_to_ptr.hbm [resolvable:$true] %s157_s22 }
   0x7   :  { %v100_v3 = vsub.f32 %v97_v1, %v98_v2  ;;  %185 = vset.pattern.permute.xlu0 %v242_v14  ;;  %v99_v18 = vld [vmem:[%s280_s2] sm:$0xff]  ;;  %s243_s2 = smov [#allocation6]  }
   0x8   :  { %v119_v21 = vsub.f32 1.0, %v99_v18  ;;  %s155_s19 = sshll.u32 %s243_s2, 4  ;;  %s156_s19 = int_to_ptr.vmem [resolvable:$true] %s155_s19 }
   0x9   :  { %v101_v4 = vadd.f32 1e-06, %v100_v3 }
   0xb   :  { %v102_v5 = vmul.f32 %v101_v4, %v101_v4 }
   0xd   :  { %v104_v6 = vsel %vm103_vm1, %v102_v5, 0.0  ;;  %v126_v33 = vld [vmem:[#allocation2] sm:$0x1] }
   0xe   :  { %105 = vadd.xlane.f32.xlu0 %v104_v6 }
  0x81   :  { %v106_v7 = vpop.xlane.xlu0 %105 }
  0x82   :  { %186 = vrsqrt.f32 %v106_v7  ;;  %vm114_vm2 = vcmp.eq.f32.partialorder %v106_v7, inf  ;;  %v117_v16 = vand.u32 2147483648, %v106_v7  ;;  %vm116_vm3 = vcmp.eq.f32.partialorder %v106_v7, 0.0 }
  0x83   :  { %v120_v24 = vmul.f32 %v119_v21, %v106_v7 }
  0x88   :  { %v187_v8 = vpop.eup %186 }
  0x89   :  { %v108_v9 = vmul.f32 %v187_v8, %v106_v7 }
  0x8b   :  { %v109_v10 = vmul.f32 %v187_v8, %v108_v9 }
  0x8d   :  { %v110_v11 = vmul.f32 0.5, %v109_v10 }
  0x8f   :  { %v111_v12 = vsub.f32 1.5, %v110_v11 }
  0x91   :  { %v112_v13 = vmul.f32 %v187_v8, %v111_v12 }
  0x93   :  { %v113_v15 = vmul.f32 %v112_v13, %v106_v7 }
  0x95   :  { %v115_v17 = vsel %vm114_vm2, %v106_v7, %v113_v15 }
  0x96   :  { %v118_v19 = vsel %vm116_vm3, %v117_v16, %v115_v17 }
  0x97   :  { %v121_v20 = vsub.f32 2.0, %v118_v19 }
  0x99   :  { %v122_v22 = vmax.f32 %v121_v20, 0.0 }
  0x9b   :  { %v123_v23 = vmul.f32 %v122_v22, %v122_v22 }
  0x9d   :  { %v124_v25 = vmul.f32 %v123_v23, %v99_v18 }
  0x9f   :  { %v125_v26 = vadd.f32 %v124_v25, %v120_v24 }
  0xa1   :  { %v128_v27 = vsel %vm127_vm4, %v125_v26, 0.0 }
  0xa2   :  { %v129_v28 = vrot.slane %v128_v27, 4 }
  0xa4   :  { %v130_v29 = vadd.f32 %v129_v28, %v128_v27 }
  0xa6   :  { %v131_v30 = vrot.slane %v130_v29, 2 }
  0xa8   :  { %v132_v31 = vadd.f32 %v131_v30, %v130_v29 }
  0xaa   :  { %v133_v32 = vrot.slane %v132_v31, 1 }
  0xac   :  { %v134_v34 = vadd.f32 %v133_v32, %v132_v31 }
  0xae   :  { %v135_v35 = vadd.f32 %v134_v34, %v126_v33 }
  0xb0   :  { %137 = vst.msk [vmem:[#allocation2] sm:$0x1] %vm95_vm0, %v135_v35 }
  0xb7   :  { %v141_v36 = vld [vmem:[#allocation2] sm:$0x1] }
  0xb8   :  { %v142_v37 = vmul.f32 0.125, %v141_v36 }
  0xba   :  { %v144_v38 = vperm.slane %v142_v37, 0 }
  0xbc   :  { %146 = vperm.xlu0 %185, %v144_v38  }
 0x12e   :  { %v147_v39 = vpop.permute.xlu0 %146 }
 0x12f   :  { %149 = vst [vmem:[#allocation6] sm:$0xff] %v147_v39 }
 0x130   :  { %160 = dma.vmem_to_hbm [thread:$0]  %s156_s19, 128, %s158_s22, [#allocation5]  }
 0x131   :  { %238 = dma.done.wait [#allocation5], 128  }
 0x132   :  { %239 = vsyncadd [#allocation5], 4294967168 }
 0x133   :  { %165 = vsyncpa [#allocation4], 1 }
 0x134   :  { %166 = vsyncpa [#allocation5], 1 }

</bundles_post_ra>
